<compile_context>
chip_gen: v7x
topology: tpu7x:2x2x1
jax: 0.10.0
libtpu: 0.0.40
codegen_flags: <defaults>
</compile_context>

<pallas_src>
import functools
import math

import jax
import jax.numpy as jnp
from jax.experimental import pallas as pl
from jax.experimental.pallas import tpu as pltpu


def _round_up(n, m):
    return ((n + m - 1) // m) * m


# ---------------------------------------------------------------------------
# Kernels
# ---------------------------------------------------------------------------
def _halfwidth_kernel(x_ref, freqs_ref, out_ref, *, half_dim):
    """half_dim % 128 == 0: exact sin/cos, two unmasked 128-aligned half stores."""
    x = x_ref[...]                                   # (TB, 1)        f32
    arg = x * freqs_ref[...]                         # (TB, half_dim) f32
    out_ref[:, :half_dim] = jnp.sin(arg).astype(out_ref.dtype)
    out_ref[:, half_dim:] = jnp.cos(arg).astype(out_ref.dtype)


def _phasefold_kernel(x_ref, freqs_ref, phase_ref, out_ref):
    """Generic dims: cos(t) = sin(t + pi/2); one dense lane-width store."""
    x = x_ref[...]                                   # (TB, 1)          f32
    arg = x * freqs_ref[...] + phase_ref[...]        # (TB, dim_padded) f32
    out_ref[...] = jnp.sin(arg).astype(out_ref.dtype)


# ---------------------------------------------------------------------------
# Wrapper
# ---------------------------------------------------------------------------
def _pick_row_tile(B, cols, out_dtype):
    itemsize = jnp.dtype(out_dtype).itemsize
    sub = max(8, 32 // itemsize)            # sublane align: 8 f32, 16 bf16, 32 int8/fp8
    budget_bytes = 8 * 1024 * 1024          # 2 double-buffered out tiles <= ~8 MiB (v7x-safe)
    tb = budget_bytes // max(1, 2 * cols * itemsize)
    tb = max(sub, (tb // sub) * sub)
    # Cap so grid >= 2 whenever B allows it -> megacore split on v7x.
    tb = min(tb, _round_up(pl.cdiv(B, 2), sub))
    tb = min(tb, _round_up(B, sub))
    return max(sub, tb)


def _compiler_params():
    return pltpu.CompilerParams(
        dimension_semantics=("parallel",),
        vmem_limit_bytes=32 * 1024 * 1024,
    )


def _sinusoidal_pos_emb_pallas(x, dim, out_dtype=jnp.float32):
    half_dim = dim // 2
    scale = math.log(10000.0) / (half_dim - 1)
    B = x.shape[0]

    x2d = x.astype(jnp.float32).reshape(B, 1)
    freqs = jnp.exp(jnp.arange(half_dim, dtype=jnp.float32) * jnp.float32(-scale))
    itemsize = jnp.dtype(out_dtype).itemsize

    if half_dim % 128 == 0:
        # Exact half-width variant: both half-slabs are 128-lane aligned.
        tb = _pick_row_tile(B, dim, out_dtype)
        grid = (pl.cdiv(B, tb),)
        kernel = functools.partial(_halfwidth_kernel, half_dim=half_dim)
        return pl.pallas_call(
            kernel,
            out_shape=jax.ShapeDtypeStruct((B, dim), out_dtype),
            grid=grid,
            in_specs=[
                pl.BlockSpec((tb, 1), lambda i: (i, 0)),
                pl.BlockSpec((1, half_dim), lambda i: (0, 0)),   # resident freq row
            ],
            out_specs=pl.BlockSpec((tb, dim), lambda i: (i, 0)),
            compiler_params=_compiler_params(),
            cost_estimate=pl.CostEstimate(
                flops=2 * B * dim,
                transcendentals=B * dim,
                bytes_accessed=itemsize * B * dim + 4 * B + 4 * half_dim),
        )(x2d, freqs.reshape(1, half_dim))

    # Generic path: phase-folded single sin into a lane-dense padded output.
    dim_padded = _round_up(dim, 128)
    freqs_row = jnp.zeros((dim_padded,), jnp.float32)
    freqs_row = freqs_row.at[:half_dim].set(freqs).at[half_dim:dim].set(freqs)
    phase_row = jnp.zeros((dim_padded,), jnp.float32)
    phase_row = phase_row.at[half_dim:dim].set(jnp.float32(math.pi / 2.0))

    tb = _pick_row_tile(B, dim_padded, out_dtype)
    grid = (pl.cdiv(B, tb),)
    out_padded = pl.pallas_call(
        _phasefold_kernel,
        out_shape=jax.ShapeDtypeStruct((B, dim_padded), out_dtype),
        grid=grid,
        in_specs=[
            pl.BlockSpec((tb, 1), lambda i: (i, 0)),
            pl.BlockSpec((1, dim_padded), lambda i: (0, 0)),     # resident freq row
            pl.BlockSpec((1, dim_padded), lambda i: (0, 0)),     # resident phase row
        ],
        out_specs=pl.BlockSpec((tb, dim_padded), lambda i: (i, 0)),
        compiler_params=_compiler_params(),
        cost_estimate=pl.CostEstimate(
            flops=3 * B * dim_padded,
            transcendentals=B * dim_padded,
            bytes_accessed=itemsize * B * dim_padded + 4 * B + 8 * dim_padded),
    )(x2d, freqs_row.reshape(1, dim_padded), phase_row.reshape(1, dim_padded))

    if dim_padded == dim:
        return out_padded
    return out_padded[:, :dim]


def _sinusoidal_pos_emb_ref(x, dim):
    half_dim = dim // 2
    scale = math.log(10000.0) / (half_dim - 1)
    freqs = jnp.exp(jnp.arange(half_dim, dtype=jnp.float32) * -scale)
    emb = x.astype(jnp.float32)[:, None] * freqs[None, :]
    return jnp.concatenate([jnp.sin(emb), jnp.cos(emb)], axis=-1)


def sinusoidal_pos_emb(x, dim, *, out_dtype=jnp.float32, use_pallas=None):
    """SinusoidalPosEmb.forward.  x: (B,) timesteps -> (B, dim) embedding."""
    assert dim % 2 == 0, "dim must be even"
    assert dim > 2, "dim == 2 divides by zero in the log-scale (same as the torch module)"
    B = x.shape[0]
    if use_pallas is None:
        # Tiny invocations: launch overhead dominates, let XLA fuse the reference.
        use_pallas = (B * dim) >= 100_000
    if use_pallas:
        return _sinusoidal_pos_emb_pallas(x, dim, out_dtype=out_dtype)
    return _sinusoidal_pos_emb_ref(x, dim).astype(out_dtype)


if __name__ == "__main__":
    k0, k1, k2, k3 = jax.random.split(jax.random.PRNGKey(0), 4)

    # Path 1: half_dim % 128 == 0 -> exact half-width sin/cos kernel, grid=(2,).
    B1, dim1 = 16, 256
    x1 = jax.random.uniform(k0, (B1,), dtype=jnp.float32, minval=0.0, maxval=1000.0)
    out1 = jax.block_until_ready(sinusoidal_pos_emb(x1, dim1, use_pallas=True))
    ref1 = _sinusoidal_pos_emb_ref(x1, dim1)
    assert out1.shape == (B1, dim1)
    assert jnp.allclose(out1, ref1, atol=1e-5, rtol=1e-5), "halfwidth path mismatch"

    # Path 2: dim % 128 == 0 but half_dim not -> phase-folded dense store.
    B2, dim2 = 8, 128
    x2 = jax.random.uniform(k1, (B2,), dtype=jnp.float32, minval=0.0, maxval=1000.0)
    out2 = jax.block_until_ready(sinusoidal_pos_emb(x2, dim2, use_pallas=True))
    ref2 = _sinusoidal_pos_emb_ref(x2, dim2)
    assert out2.shape == (B2, dim2)
    assert jnp.allclose(out2, ref2, atol=5e-4, rtol=1e-4), "phasefold path mismatch"

    # Path 3: dim not a multiple of 128 -> lane-padded output, sliced in wrapper.
    B3, dim3 = 8, 96
    x3 = jax.random.uniform(k2, (B3,), dtype=jnp.float32, minval=0.0, maxval=1000.0)
    out3 = jax.block_until_ready(sinusoidal_pos_emb(x3, dim3, use_pallas=True))
    ref3 = _sinusoidal_pos_emb_ref(x3, dim3)
    assert out3.shape == (B3, dim3)
    assert jnp.allclose(out3, ref3, atol=5e-4, rtol=1e-4), "padded path mismatch"

    # Path 4: bf16 output (16-sublane aligned tile), halves HBM writeback bytes.
    B4, dim4 = 32, 256
    x4 = jax.random.uniform(k3, (B4,), dtype=jnp.float32, minval=0.0, maxval=1000.0)
    out4 = jax.block_until_ready(
        sinusoidal_pos_emb(x4, dim4, out_dtype=jnp.bfloat16, use_pallas=True))
    ref4 = _sinusoidal_pos_emb_ref(x4, dim4)
    assert out4.shape == (B4, dim4) and out4.dtype == jnp.bfloat16
    assert jnp.allclose(out4.astype(jnp.float32), ref4, atol=1e-2, rtol=1e-2), "bf16 mismatch"

    print("KERNEL_OK")
</pallas_src>

<mosaic_0001>
module attributes {stable_mosaic.version = 11 : i64} {
  func.func @_halfwidth_kernel(%arg0: i32, %arg1: memref<8x1xf32, #tpu.memory_space<vmem>>, %arg2: memref<1x128xf32, #tpu.memory_space<vmem>>, %arg3: memref<8x256xf32, #tpu.memory_space<vmem>>) attributes {dimension_semantics = [#tpu.dimension_semantics<parallel>], iteration_bounds = array<i64: 2>, scalar_prefetch = 0 : i64, scratch_operands = 0 : i64, tpu.core_type = #tpu.core_type<tc>, window_params = [{transform_indices = @transform_0, window_bounds = array<i64: 8, 1>}, {pipeline_mode = #tpu.pipeline_mode<synchronous>, transform_indices = @transform_1, window_bounds = array<i64: 1, 128>}, {transform_indices = @transform_2, window_bounds = array<i64: 8, 256>}]} {
    %c0 = arith.constant 0 : index
    %c0_0 = arith.constant 0 : index
    %0 = vector.load %arg1[%c0, %c0_0] : memref<8x1xf32, #tpu.memory_space<vmem>>, vector<8x1xf32>
    %c0_1 = arith.constant 0 : index
    %c0_2 = arith.constant 0 : index
    %1 = vector.load %arg2[%c0_1, %c0_2] : memref<1x128xf32, #tpu.memory_space<vmem>>, vector<1x128xf32>
    %2 = vector.broadcast %0 : vector<8x1xf32> to vector<8x128xf32>
    %3 = vector.broadcast %1 : vector<1x128xf32> to vector<8x128xf32>
    %4 = arith.mulf %2, %3 : vector<8x128xf32>
    %5 = math.sin %4 : vector<8x128xf32>
    %c0_3 = arith.constant 0 : index
    %c0_4 = arith.constant 0 : index
    %6 = vector.load %arg3[%c0_3, %c0_4] : memref<8x256xf32, #tpu.memory_space<vmem>>, vector<8x128xf32>
    tpu.vector_store %arg3[%c0_3, %c0_4], %5 {strides = array<i32>} : memref<8x256xf32, #tpu.memory_space<vmem>>, vector<8x128xf32>,
    %7 = math.cos %4 : vector<8x128xf32>
    %c0_5 = arith.constant 0 : index
    %c128 = arith.constant 128 : index
    %8 = vector.load %arg3[%c0_5, %c128] : memref<8x256xf32, #tpu.memory_space<vmem>>, vector<8x128xf32>
    tpu.vector_store %arg3[%c0_5, %c128], %7 {strides = array<i32>} : memref<8x256xf32, #tpu.memory_space<vmem>>, vector<8x128xf32>,
    return
  }
  func.func @transform_0(%arg0: i32) -> (i32, i32) {
    %c0_i32 = arith.constant 0 : i32
    %c0_i32_0 = arith.constant 0 : i32
    return %arg0, %c0_i32 : i32, i32
  }
  func.func @transform_1(%arg0: i32) -> (i32, i32) {
    %c0_i32 = arith.constant 0 : i32
    %c0_i32_0 = arith.constant 0 : i32
    %c0_i32_1 = arith.constant 0 : i32
    return %c0_i32, %c0_i32_0 : i32, i32
  }
  func.func @transform_2(%arg0: i32) -> (i32, i32) {
    %c0_i32 = arith.constant 0 : i32
    %c0_i32_0 = arith.constant 0 : i32
    return %arg0, %c0_i32 : i32, i32
  }
}

</mosaic_0001>

<bundles_post_ra>
// kernel: tpu_custom_call.1
= control target key start
LH: loop header
LB: loop body
LE: loop exit
PB: predicated region body
PF: predicated region fallthrough
CT: control target
= control target key end

     0   :  { %7 = vsyncpa [#allocation3], 0  ;;  %s727_s0 = inlined_call_operand.vmem [shape: f32[16,1], index: 0, kind: input, shape index: {}]   ;;  %s728_s1 = inlined_call_operand.vmem [shape: f32[1,128], index: 1, kind: input, shape index: {}]   ;;  %s729_s2 = inlined_call_operand.hbm [shape: f32[16,256], index: 2, kind: output, shape index: {}]  }
   0x1   :  { %9 = vsyncpa [#allocation3 + $0x1], 0  ;;  %s599_s9 = smov 0   ;;  %s601_s10 = smov 0  }
   0x2   :  { %s603_s11 = smov 0   ;;  %s605_s12 = smov 0  }
   0x3 LB: > { %s620_s13 = sadd.s32 4294967295, %s574_s12   ;;  %s436_s14 = sadd.s32 4294967294, %s574_s12   ;;  %s574_s12 = sphi %s605_s12, %s735_s12   ;;  %s570_s11 = sphi %s603_s11, %s734_s11   ;;  %s566_s10 = sphi %s601_s10, %s733_s10   ;;  %s562_s9 = sphi %s599_s9, %s732_s9  }
   0x4   : > { %s624_s15 = sadd.s32 1, %s574_s12   ;;  %s69_s16 = sadd.s32 1, %s570_s11 }
   0x5   : > { %s66_s17 = ssub.s32 %s574_s12, %s624_s15  ;;  %p79_p0 = scmp.ne.s32.totalorder %s570_s11, %s566_s10 }
   0x6   : > { %p67_p1 = scmp.eq.s32.totalorder %s66_s17, 0  ;;  %p80_p2 = scmp.eq.s32.totalorder %s620_s13, 1 }
   0x7   : > { %p85_p3 = scmp.ne.s32.totalorder %s566_s10, %s562_s9  ;;  %p86_p4 = scmp.eq.s32.totalorder %s436_s14, 1 }
   0x8   : > { %s635_s18 = scalar_select %p67_p1, %s570_s11, %s69_s16  }
   0x9   : > { %p637_p5 = por %p80_p2, %p79_p0  ;;  %p641_p6 = por %p86_p4, %p85_p3 }
   0xa   : > { %p439_p7 = scmp.ge.s32.totalorder %s574_s12, 1  ;;  %p114_p8 = scmp.lt.s32.totalorder %s574_s12, 3 }
   0xc   : > { %p115_p9 = pnand %p439_p7, %p114_p8 }
   0xd   : > { %p135_p10 = scmp.lt.s32.totalorder (!%p115_p9), %s620_s13, 1  ;;  %v576_v0 = vmov (!%p115_p9), 0   ;;  %v442_v2 = vld [vmem:[%s728_s1] ss:$0 sm:$0xff] (!%p115_p9)  ;;  %v577_v15 = vmov (!%p115_p9), 683565275  }
   0xe   : > { %118 = sbr.rel (%p115_p9) target bundleno = 249 (0xf9), region = 28  ;;  %507 = vset.pattern.permute.xlu0 (!%p115_p9), %v576_v0  ;;  %v578_v17 = vmov (!%p115_p9), 2475754826   ;;  %v579_v20 = vmov (!%p115_p9), 2131351028   ;;  %s132_s28 = sand.u32 (!%p115_p9), 1, %s566_s10  }
   0xf   : > { %v580_v23 = vmov (!%p115_p9), 2102212464   ;;  %v581_v26 = vmov (!%p115_p9), 920167782   ;;  %v582_v29 = vmov (!%p115_p9), 1326507024  }
  0x10   : > { %s440_s29 = sshll.u32 (!%p115_p9), %s132_s28, 4  ;;  %s456_s30 = sshll.u32 (!%p115_p9), %s620_s13, 8 }
  0x11   : > { %s134_s3 = scalar_lea.vmem (!%p115_p9), [#allocation2], %s440_s29  ;;  %s683_s7 = scalar_lea.hbm (!%p115_p9), %s729_s2, %s456_s30 }
  0x12   : > { %s377_s4 = sshll.u32 (!%p115_p9), %s134_s3, 4  ;;  %s363_s8 = scalar_lea.sflag (!%p115_p9), [#allocation3], %s132_s28  ;;  %s685_s4 = int_to_ptr.vmem [resolvable:$true] %s377_s4 }
  0x13   : > { %s583_s14 = smov (!%p115_p9), [#allocation2]  }
  0x14   : > { %s516_s16 = sshll.u32 (!%p115_p9), %s583_s14, 4  ;;  %s517_s16 = int_to_ptr.vmem [resolvable:$false] %s516_s16 }
  0x15   : > { %s136_s21 = scalar_select %p135_p10, %s620_s13, 1 }
  0x16   : > { %s512_s13 = scalar_lea.vmem %s685_s4, 256  ;;  %s518_s17 = scalar_lea.vmem %s517_s16, 512 }
  0x17   : > { %s441_s22 = sshll.u32 %s136_s21, 3  ;;  %p513_p11 = scmp.ne.s32.totalorder %s685_s4, %s512_s13 }
  0x18   : > { %s138_s25 = scalar_lea.vmem %s727_s0, %s441_s22  ;;  %p519_p0 = scmp.lt.s32.totalorder %s685_s4, %s517_s16 }
  0x19   : > { %v139_v1 = vld [vmem:[%s138_s25] sm:$0xff]  ;;  %p514_p12 = pnand %p513_p11, %p637_p5  ;;  %p520_p1 = scmp.lt.s32.totalorder %s518_s17, %s512_s13 }
  0x1a   : > { %143 = vperm.xlu0 %507, %v139_v1  }
  0x1b   : > { %p515_p13 = pneg %p514_p12  ;;  %p521_p2 = por %p520_p1, %p519_p0 }
  0x1d   : > { %p522_p3 = pnand %p521_p2, %p515_p13 }
  0x99   : > { %v144_v3 = vpop.permute.xlu0 %143 }
  0x9a   : > { %v655_v4 = vmul.f32 %v442_v2, %v144_v3 }
  0x9c   : > { %v156_v5 = vand.u32 2139095040, %v655_v4  ;;  %v153_v9 = vand.u32 2147483647, %v655_v4  ;;  %vm155_vm7 = vcmp.lt.s32.totalorder %v655_v4, 0  ;;  %vm245_vm15 = vweird.f32 %v655_v4 }
  0x9e   : > { %v157_v6 = vshrl.u32 %v156_v5, 23  ;;  %v160_v12 = vand.u32 8388607, %v153_v9  ;;  %vm154_vm8 = vcmp.le.f32.partialorder %v153_v9, 0.7853982 }
  0xa0   : > { %v443_v7 = vadd.s32 4294967169, %v157_v6  ;;  %v161_v31 = vor.u32 8388608, %v160_v12 }
  0xa2   : > { %v163_v8 = vadd.s32 1, %v443_v7  ;;  %v201_v45 = vshll.u32 %v161_v31, 8 }
  0xa4   : > { %vm164_vm0 = vcmp.gt.s32.totalorder %v163_v8, 0 }
  0xa5   : > { %v165_v10 = vsel %vm164_vm0, %v163_v8, 0 }
  0xa6   : > { %v167_v11 = vand.u32 31, %v165_v10  ;;  %v166_v14 = vshrl.u32 %v165_v10, 5 }
  0xa8   : > { %v168_v13 = vsub.s32 32, %v167_v11  ;;  %v170_v16 = vshll.u32 %v577_v15, %v167_v11  ;;  %v173_v18 = vshll.u32 %v578_v17, %v167_v11  ;;  %v176_v22 = vshll.u32 %v579_v20, %v167_v11 }
  0xa9   : > { %v179_v25 = vshll.u32 %v580_v23, %v167_v11  ;;  %v182_v28 = vshll.u32 %v581_v26, %v167_v11  ;;  %vm185_vm1 = vcmp.lt.s32.totalorder %v166_v14, 1  ;;  %vm188_vm2 = vcmp.lt.s32.totalorder %v166_v14, 4 }
  0xaa   : > { %v171_v19 = vshrl.u32 %v578_v17, %v168_v13  ;;  %v174_v21 = vshrl.u32 %v579_v20, %v168_v13  ;;  %v177_v24 = vshrl.u32 %v580_v23, %v168_v13  ;;  %v180_v27 = vshrl.u32 %v581_v26, %v168_v13 }
  0xab   : > { %v183_v30 = vshrl.u32 %v582_v29, %v168_v13  ;;  %v169_v40 = vshrl.u32 %v577_v15, %v168_v13  ;;  %vm187_vm3 = vcmp.lt.s32.totalorder %v166_v14, 3  ;;  %vm186_vm4 = vcmp.lt.s32.totalorder %v166_v14, 2 }
  0xac   : > { %v172_v32 = vor.u32 %v171_v19, %v170_v16  ;;  %v175_v33 = vor.u32 %v174_v21, %v173_v18  ;;  %v178_v34 = vor.u32 %v177_v24, %v176_v22  ;;  %v181_v35 = vor.u32 %v180_v27, %v179_v25 }
  0xad   : > { %v184_v36 = vor.u32 %v183_v30, %v182_v28 }
  0xae   : > { %v190_v37 = vsel %vm188_vm2, %v178_v34, 2102212464  ;;  %v193_v38 = vsel %vm185_vm1, %v172_v32, %v175_v33  ;;  %v197_v39 = vsel %vm185_vm1, %v175_v33, %v178_v34  ;;  %v194_v41 = vsel %vm188_vm2, %v181_v35, 920167782 }
  0xaf   : > { %v198_v42 = vsel %vm188_vm2, %v184_v36, 1326507024  ;;  %v195_v43 = vsel %vm187_vm3, %v178_v34, %v194_v41  ;;  %v189_v46 = vsel %vm185_vm1, %v169_v40, %v172_v32  ;;  %v191_v47 = vsel %vm187_vm3, %v175_v33, %v190_v37 }
  0xb0   : > { %v199_v44 = vsel %vm187_vm3, %v181_v35, %v198_v42  ;;  %v196_v48 = vsel %vm186_vm4, %v193_v38, %v195_v43  ;;  %v192_v54 = vsel %vm186_vm4, %v189_v46, %v191_v47 }
  0xb1   : > { %v200_v49 = vsel %vm186_vm4, %v197_v39, %v199_v44  ;;  %v664_v52 = vmul.u32.u64.low %v201_v45, %v196_v48  ;;  %v665_v53 = vmul.u32.u64.high %v201_v45, %v196_v48, %v664_v52  ;;  %v208_v56 = vmul.u32 %v201_v45, %v192_v54 }
  0xb2   : > { %v661_v50 = vmul.u32.u64.low %v201_v45, %v200_v49  ;;  %v662_v51 = vmul.u32.u64.high %v201_v45, %v200_v49, %v661_v50 }
  0xb3   : > { %v211_v55 = vadd.s32 1, %v665_v53 }
  0xb4   : > { %vm210_vm5 = vc.u32 %v662_v51, %v664_v52  ;;  %v209_v5 = vadd.s32 %v664_v52, %v662_v51 }
  0xb5   : > { %v212_v57 = vsel %vm210_vm5, %v211_v55, %v665_v53 }
  0xb6   : > { %v213_v58 = vadd.s32 %v212_v57, %v208_v56 }
  0xb8   : > { %v214_v59 = vadd.s32 536870912, %v213_v58 }
  0xba   : > { %v215_v60 = vshrl.u32 %v214_v59, 30 }
  0xbc   : > { %v216_v61 = vshll.u32 %v215_v60, 30  ;;  %v239_v18 = vsub.s32 4, %v215_v60 }
  0xbe   : > { %v217_v62 = vsub.s32 %v213_v58, %v216_v61  ;;  %v240_v21 = vsel %vm155_vm7, %v239_v18, %v215_v60 }
  0xbf   : > { %v242_v23 = vsel %vm154_vm8, 0, %v240_v21 }
  0xc0   : > { %v219_v63 = vsub.s32 0, %v217_v62  ;;  %v246_v24 = vadd.s32 3, %v242_v23  ;;  %v351_v26 = vand.u32 3, %v242_v23 }
  0xc2   : > { %v444_v0 = vmin.u32 %v219_v63, %v217_v62  ;;  %v247_v25 = vand.u32 3, %v246_v24  ;;  %vm356_vm10 = vcmp.eq.s32.totalorder %v351_v26, 2  ;;  %vm353_vm12 = vcmp.eq.s32.totalorder %v351_v26, 0 }
  0xc3   : > { %vm352_vm14 = vcmp.lt.s32.totalorder %v351_v26, 2 }
  0xc4   : > { %v221_v1 = vclz %v444_v0  ;;  %vm252_vm9 = vcmp.eq.s32.totalorder %v247_v25, 2  ;;  %vm249_vm11 = vcmp.eq.s32.totalorder %v247_v25, 0  ;;  %vm248_vm13 = vcmp.lt.s32.totalorder %v247_v25, 2 }
  0xc6   : > { %v445_v2 = vadd.s32 4294967294, %v221_v1 }
  0xc8   : > { %vm446_vm6 = vcmp.lt.s32.totalorder %v445_v2, 0 }
  0xc9   : > { %v224_v3 = vsel %vm446_vm6, 0, %v445_v2 }
  0xca   : > { %v225_v6 = vsub.s32 32, %v224_v3  ;;  %v229_v7 = vsub.s32 4294967266, %v224_v3  ;;  %v226_v8 = vshll.u32 %v217_v62, %v224_v3 }
  0xcc   : > { %v227_v10 = vshrl.u32 %v209_v5, %v225_v6  ;;  %v230_v11 = vadd.s32 127, %v229_v7 }
  0xce   : > { %v228_v12 = vor.u32 %v227_v10, %v226_v8  ;;  %v231_v13 = vshll.u32 %v230_v11, 23 }
  0xd0   : > { %v232_v14 = vor.u32 4788187, %v231_v13  ;;  %v235_v16 = vcvt.s32.f32 %v228_v12 }
  0xd2   : > { %v233_v15 = vand.u32 2147483647, %v232_v14 }
  0xd4   : > { %v236_v17 = vmul.f32 %v235_v16, %v233_v15 }
  0xd6   : > { %v237_v19 = vxor.u32 2147483648, %v236_v17 }
  0xd8   : > { %v238_v20 = vsel %vm155_vm7, %v237_v19, %v236_v17 }
  0xd9   : > { %v241_v22 = vsel %vm154_vm8, %v655_v4, %v238_v20 }
  0xda   : > { %508 = vcosq.f32 %v241_v22 }
  0xdb   : > { %510 = vsinq.f32 %v241_v22 }
  0xe4   : > { %v509_v27 = vpop.eup %508 }
  0xe5   : > { %v511_v28 = vpop.eup %510  ;;  %v253_v29 = vxor.u32 2147483648, %v509_v27 }
  0xe6   : > { %v250_v30 = vxor.u32 2147483648, %v511_v28 }
  0xe7   : > { %v254_v9 = vsel %vm252_vm9, %v253_v29, %v511_v28  ;;  %v358_v31 = vsel %vm356_vm10, %v253_v29, %v511_v28 }
  0xe8   : > { %v251_v32 = vsel %vm249_vm11, %v509_v27, %v250_v30  ;;  %v355_v33 = vsel %vm353_vm12, %v509_v27, %v250_v30 }
  0xe9   : > { %v255_v34 = vsel %vm248_vm13, %v251_v32, %v254_v9  ;;  %v359_v35 = vsel %vm352_vm14, %v355_v33, %v358_v31 }
  0xea   : > { %v256_v36 = vsel %vm245_vm15, nan, %v255_v34  ;;  %v360_v37 = vsel %vm245_vm15, nan, %v359_v35 }
  0xeb   : > { %257 = vst [vmem:[%s134_s3] sm:$0xff] %v256_v36  ;;  %361 = vst [vmem:[%s134_s3 + $0x8] sm:$0xff] %v360_v37 }
  0xec   : > { %525 = shalt.err (!%p522_p3)
}
  0xed   : > { %s526_s21 = scalar_lea.hbm %s683_s7, 256  ;;  %s530_s24 = scalar_lea.hbm %s729_s2, 512 }
  0xee   : > { %p527_p4 = scmp.ne.s32.totalorder %s683_s7, %s526_s21  ;;  %p531_p9 = scmp.lt.u32.totalorder %s683_s7, %s729_s2 }
  0xef   : > { %p532_p10 = scmp.lt.u32.totalorder %s530_s24, %s526_s21  ;;  %p534_p12 = scmp.lt.u32.totalorder %s526_s21, %s683_s7 }
  0xf0   : > { %p528_p7 = pnand %p527_p4, %p637_p5 }
  0xf1   : > { %p533_p11 = por %p532_p10, %p531_p9 }
  0xf2   : > { %p529_p8 = pneg %p528_p7 }
  0xf3   : > { %p535_p13 = por %p534_p12, %p533_p11 }
  0xf5   : > { %p536_p0 = pnand %p535_p13, %p529_p8 }
  0xf7   : > { %539 = shalt.err (!%p536_p0)
}
  0xf8   : > { %461 = dma.vmem_to_hbm [thread:$0]  (%p637_p5), %s685_s4, 256, %s683_s7, %s363_s8  }
  0xf9 PF: > { %p467_p1 = scmp.ge.s32.totalorder %s574_s12, 2  ;;  %s389_s27 = sand.u32 1, %s562_s9  }
  0xfa   : > { %s390_s28 = scalar_lea.sflag [#allocation3], %s389_s27 }
  0xfb   : > { %p464_p2 = pnand %p467_p1, %p641_p6 }
  0xfd   : > { %557 = dma.done.wait (!%p464_p2), %s390_s28, 256  }
  0xfe   : > { %559 = vsyncadd (!%p464_p2), %s390_s28, 4294967040  ;;  %p12_p3 = scmp.ge.s32.totalorder %s624_s15, 4   ;;  %s732_s9 = smov %s566_s10 }
  0xff   : > { %s733_s10 = smov %s570_s11  ;;  %s734_s11 = smov %s635_s18 }
 0x100   : > { %s735_s12 = smov %s624_s15  ;;  %14 = sbr.rel (!%p12_p3) target bundleno = 3 (0x3), region = 63 }
 0x107   :  { %395 = vsyncpa [#allocation3], 1 }
 0x108   :  { %397 = vsyncpa [#allocation3 + $0x1], 1 }

</bundles_post_ra>
